<compile_context>
chip_gen: v5e
topology: v5e:2x2
jax: 0.10.0
libtpu: 0.0.40
codegen_flags: <defaults>
</compile_context>

<pallas_src>
import functools

import jax
import jax.numpy as jnp
from jax import lax
from jax.experimental import pallas as pl
from jax.experimental.pallas import tpu as pltpu


def _self_rep_kernel(c_ij_ref, c_ji_ref, x_ref, coef_ref, out_ref, acc_ref,
                     *, x_resident: bool, tile: int):
    i = pl.program_id(0)
    j = pl.program_id(1)

    # coef tile = (|C[i,j]| + |C[j,i]|^T) / 2 — one (T, T) tile transpose (XLU).
    sym = (jnp.abs(c_ij_ref[...]) + jnp.abs(c_ji_ref[...]).T) * 0.5

    # Zero the global diagonal. Square tiles => the global diagonal is the
    # local diagonal of tiles with i == j.  The mask is fused into a single
    # select so the result stays local (one store, no coef_ref reload below).
    row = lax.broadcasted_iota(jnp.int32, sym.shape, 0)
    col = lax.broadcasted_iota(jnp.int32, sym.shape, 1)
    on_diag = jnp.logical_and(i == j, row == col)
    coef = jnp.where(on_diag, 0.0, sym)
    coef_ref[...] = coef.astype(coef_ref.dtype)

    # Rows of x belonging to column-block j.
    if x_resident:
        start = pl.multiple_of(j * tile, tile)
        x_blk = x_ref[pl.ds(start, tile), :]
    else:
        x_blk = x_ref[...]

    # Accumulate out = coef @ x across the j (reduction) axis.
    @pl.when(j == 0)
    def _():
        acc_ref[...] = jnp.zeros_like(acc_ref)

    acc_ref[...] += jnp.dot(coef, x_blk, preferred_element_type=jnp.float32)

    @pl.when(j == pl.num_programs(1) - 1)
    def _():
        out_ref[...] = acc_ref[...].astype(out_ref.dtype)


def _pick_tile(n_padded: int) -> int:
    # Largest square tile (<= 512, the measured VMEM / pipelining sweet spot)
    # that divides the padded N AND leaves >= 2 row-blocks so the "parallel"
    # i axis can shard across v7x's two TensorCores.  Tiny problems fall back
    # to a single 128 block.
    for t in (512, 256, 128):
        if n_padded % t == 0 and n_padded // t >= 2:
            return t
    return 128


def self_representation(C, x):
    """C: (N, N) float32, x: (N, D) float32 -> (coef (N, N), output (N, D))."""
    N = C.shape[0]
    D = x.shape[1]
    assert C.shape == (N, N) and x.shape[0] == N

    # ---- wrapper-side layout plumbing (pure padding, no compute) ----------
    Np = ((N + 127) // 128) * 128               # tile-divisible rows/cols
    Dp = ((max(D, 1) + 127) // 128) * 128       # lane-dense feature dim

    C_p = C if Np == N else jnp.pad(C, ((0, Np - N), (0, Np - N)))
    x_p = x if (Np == N and Dp == D) else jnp.pad(x, ((0, Np - N), (0, Dp - D)))

    T = _pick_tile(Np)
    gi = gj = Np // T

    # x resident in VMEM (DMA'd once) whenever it fits a budget that is safe
    # on every generation; otherwise stream (T, Dp) slabs indexed by j.
    x_bytes = 4 * Np * Dp
    x_resident = x_bytes <= (8 << 20)
    if x_resident:
        x_spec = pl.BlockSpec((Np, Dp), lambda i, j: (0, 0))
    else:
        x_spec = pl.BlockSpec((T, Dp), lambda i, j: (j, 0))

    # Explicit scoped-VMEM budget from the actual per-step footprint
    # (double-buffered c_ij / c_ji / coef tiles + x + out + acc), clamped to
    # 48 MiB so it stays inside v7x's 64 MiB physical VMEM.
    cbuf = 2 * 3 * T * T * 4
    xbuf = 2 * (x_bytes if x_resident else T * Dp * 4)
    obuf = 2 * T * Dp * 4 + T * Dp * 4
    vmem_limit = int(min(max(int(1.25 * (cbuf + xbuf + obuf)) + (2 << 20),
                             32 << 20),
                         48 << 20))

    x_reads = 1 if x_resident else gi
    cost = pl.CostEstimate(
        flops=2 * Np * Np * Dp,
        transcendentals=0,
        bytes_accessed=4 * (3 * Np * Np + Np * Dp * (x_reads + 1)),
    )

    kernel = functools.partial(_self_rep_kernel, x_resident=x_resident, tile=T)

    coef_p, out_p = pl.pallas_call(
        kernel,
        out_shape=(
            jax.ShapeDtypeStruct((Np, Np), jnp.float32),
            jax.ShapeDtypeStruct((Np, Dp), jnp.float32),
        ),
        grid_spec=pltpu.PrefetchScalarGridSpec(
            num_scalar_prefetch=0,
            grid=(gi, gj),
            in_specs=[
                pl.BlockSpec((T, T), lambda i, j: (i, j)),   # C[i, j] tile
                pl.BlockSpec((T, T), lambda i, j: (j, i)),   # C[j, i] tile
                x_spec,                                       # x (resident or per-j slab)
            ],
            out_specs=[
                pl.BlockSpec((T, T), lambda i, j: (i, j)),   # coef tile
                pl.BlockSpec((T, Dp), lambda i, j: (i, 0)),  # out rows (resident over j)
            ],
            scratch_shapes=[pltpu.VMEM((T, Dp), jnp.float32)],
        ),
        compiler_params=pltpu.CompilerParams(
            dimension_semantics=("parallel", "arbitrary"),
            vmem_limit_bytes=vmem_limit,
        ),
        cost_estimate=cost,
    )(C_p, C_p, x_p)

    coef = coef_p if Np == N else coef_p[:N, :N]
    out = out_p if (Np == N and Dp == D) else out_p[:N, :D]
    return coef, out


def _reference(C, x):
    sym = (jnp.abs(C) + jnp.abs(C.T)) * 0.5
    coef = sym - jnp.diag(jnp.diag(sym))
    out = jnp.dot(coef, x, precision=jax.lax.Precision.HIGHEST)
    return coef, out


if __name__ == "__main__":
    # Small synthetic sizes; N deliberately non-tile-divisible and D < 128 to
    # exercise the wrapper-side padding path and a 2x2 pipelined grid.
    N, D = 200, 32

    key = jax.random.PRNGKey(0)
    k_c, k_x = jax.random.split(key)

    # Deterministic parameter init mirroring 0.0001 * torch.rand((N, N)).
    C = 0.0001 * jax.random.uniform(k_c, (N, N), dtype=jnp.float32)
    x = jax.random.normal(k_x, (N, D), dtype=jnp.float32)

    coef, out = self_representation(C, x)
    jax.block_until_ready((coef, out))

    coef_ref, out_ref = _reference(C, x)
    assert coef.shape == (N, N) and out.shape == (N, D)
    assert jnp.allclose(coef, coef_ref, atol=1e-6, rtol=1e-6)
    assert jnp.allclose(out, out_ref, atol=2e-5, rtol=1e-3)

    print("KERNEL_OK")
</pallas_src>

<mosaic_0001>
module attributes {stable_mosaic.version = 11 : i64} {
  func.func @_self_rep_kernel(%arg0: i32, %arg1: i32, %arg2: memref<128x128xf32, #tpu.memory_space<vmem>>, %arg3: memref<128x128xf32, #tpu.memory_space<vmem>>, %arg4: memref<256x128xf32, #tpu.memory_space<vmem>>, %arg5: memref<128x128xf32, #tpu.memory_space<vmem>>, %arg6: memref<128x128xf32, #tpu.memory_space<vmem>>, %arg7: memref<128x128xf32, #tpu.memory_space<vmem>>) attributes {dimension_semantics = [#tpu.dimension_semantics<parallel>, #tpu.dimension_semantics<arbitrary>], iteration_bounds = array<i64: 2, 2>, scalar_prefetch = 0 : i64, scratch_operands = 1 : i64, tpu.core_type = #tpu.core_type<tc>, window_params = [{transform_indices = @transform_0, window_bounds = array<i64: 128, 128>}, {transform_indices = @transform_1, window_bounds = array<i64: 128, 128>}, {pipeline_mode = #tpu.pipeline_mode<synchronous>, transform_indices = @transform_2, window_bounds = array<i64: 256, 128>}, {transform_indices = @transform_3, window_bounds = array<i64: 128, 128>}, {transform_indices = @transform_4, window_bounds = array<i64: 128, 128>}]} {
    %c0 = arith.constant 0 : index
    %c0_0 = arith.constant 0 : index
    %0 = vector.load %arg2[%c0, %c0_0] : memref<128x128xf32, #tpu.memory_space<vmem>>, vector<128x128xf32>
    %1 = math.absf %0 : vector<128x128xf32>
    %c0_1 = arith.constant 0 : index
    %c0_2 = arith.constant 0 : index
    %2 = vector.load %arg3[%c0_1, %c0_2] : memref<128x128xf32, #tpu.memory_space<vmem>>, vector<128x128xf32>
    %3 = math.absf %2 : vector<128x128xf32>
    %4 = tpu.transpose %3, [1, 0] : vector<128x128xf32> -> vector<128x128xf32>
    %5 = arith.addf %1, %4 : vector<128x128xf32>
    %cst = arith.constant 5.000000e-01 : f32
    %6 = vector.broadcast %cst : f32 to vector<128x128xf32>
    %7 = arith.mulf %5, %6 : vector<128x128xf32>
    %8 = tpu.iota {dimensions = array<i32: 0>} : vector<128x128xi32>
    %9 = tpu.iota {dimensions = array<i32: 1>} : vector<128x128xi32>
    %10 = arith.cmpi eq, %arg0, %arg1 : i32
    %11 = arith.cmpi eq, %8, %9 : vector<128x128xi32>
    %12 = vector.broadcast %10 : i1 to vector<128x128xi1>
    %13 = arith.andi %12, %11 : vector<128x128xi1>
    %cst_3 = arith.constant 0.000000e+00 : f32
    %14 = vector.broadcast %cst_3 : f32 to vector<128x128xf32>
    %15 = arith.select %13, %14, %7 : vector<128x128xi1>, vector<128x128xf32>
    %c0_4 = arith.constant 0 : index
    %c0_5 = arith.constant 0 : index
    %16 = vector.load %arg5[%c0_4, %c0_5] : memref<128x128xf32, #tpu.memory_space<vmem>>, vector<128x128xf32>
    tpu.vector_store %arg5[%c0_4, %c0_5], %15 {strides = array<i32>} : memref<128x128xf32, #tpu.memory_space<vmem>>, vector<128x128xf32>,
    %c128_i32 = arith.constant 128 : i32
    %17 = arith.muli %arg1, %c128_i32 : i32
    %18 = tpu.assume_multiple %17, 128 : i32
    %19 = arith.index_cast %18 : i32 to index
    %c0_6 = arith.constant 0 : index
    %20 = vector.load %arg4[%19, %c0_6] : memref<256x128xf32, #tpu.memory_space<vmem>>, vector<128x128xf32>
    %c0_i32 = arith.constant 0 : i32
    %21 = arith.cmpi eq, %arg1, %c0_i32 : i32
    %22 = arith.extui %21 : i1 to i32
    %c0_i32_7 = arith.constant 0 : i32
    %23 = arith.cmpi ne, %22, %c0_i32_7 : i32
    scf.if %23 {
      %cst_14 = arith.constant 0.000000e+00 : f32
      %31 = vector.broadcast %cst_14 : f32 to vector<128x128xf32>
      %c0_15 = arith.constant 0 : index
      %c0_16 = arith.constant 0 : index
      %32 = vector.load %arg7[%c0_15, %c0_16] : memref<128x128xf32, #tpu.memory_space<vmem>>, vector<128x128xf32>
      tpu.vector_store %arg7[%c0_15, %c0_16], %31 {strides = array<i32>} : memref<128x128xf32, #tpu.memory_space<vmem>>, vector<128x128xf32>,
    } else {
    }
    %c0_8 = arith.constant 0 : index
    %c0_9 = arith.constant 0 : index
    %24 = vector.load %arg7[%c0_8, %c0_9] : memref<128x128xf32, #tpu.memory_space<vmem>>, vector<128x128xf32>
    %cst_10 = arith.constant dense<0.000000e+00> : vector<128x128xf32>
    %25 = tpu.matmul %15, %20, %cst_10 {dimension_numbers = #tpu.dot_dimension_numbers<[1], [0], [0], [1], [0, 0, 1, 1], [], []>} : vector<128x128xf32>, vector<128x128xf32>, vector<128x128xf32> -> vector<128x128xf32>
    %26 = arith.addf %24, %25 : vector<128x128xf32>
    %c0_11 = arith.constant 0 : index
    %c0_12 = arith.constant 0 : index
    %27 = vector.load %arg7[%c0_11, %c0_12] : memref<128x128xf32, #tpu.memory_space<vmem>>, vector<128x128xf32>
    tpu.vector_store %arg7[%c0_11, %c0_12], %26 {strides = array<i32>} : memref<128x128xf32, #tpu.memory_space<vmem>>, vector<128x128xf32>,
    %c1_i32 = arith.constant 1 : i32
    %28 = arith.cmpi eq, %arg1, %c1_i32 : i32
    %29 = arith.extui %28 : i1 to i32
    %c0_i32_13 = arith.constant 0 : i32
    %30 = arith.cmpi ne, %29, %c0_i32_13 : i32
    scf.if %30 {
      %c0_14 = arith.constant 0 : index
      %c0_15 = arith.constant 0 : index
      %31 = vector.load %arg7[%c0_14, %c0_15] : memref<128x128xf32, #tpu.memory_space<vmem>>, vector<128x128xf32>
      %c0_16 = arith.constant 0 : index
      %c0_17 = arith.constant 0 : index
      %32 = vector.load %arg6[%c0_16, %c0_17] : memref<128x128xf32, #tpu.memory_space<vmem>>, vector<128x128xf32>
      tpu.vector_store %arg6[%c0_16, %c0_17], %31 {strides = array<i32>} : memref<128x128xf32, #tpu.memory_space<vmem>>, vector<128x128xf32>,
    } else {
    }
    return
  }
  func.func @transform_0(%arg0: i32, %arg1: i32) -> (i32, i32) {
    %c0_i32 = arith.constant 0 : i32
    return %arg0, %arg1 : i32, i32
  }
  func.func @transform_1(%arg0: i32, %arg1: i32) -> (i32, i32) {
    %c0_i32 = arith.constant 0 : i32
    return %arg1, %arg0 : i32, i32
  }
  func.func @transform_2(%arg0: i32, %arg1: i32) -> (i32, i32) {
    %c0_i32 = arith.constant 0 : i32
    %c0_i32_0 = arith.constant 0 : i32
    %c0_i32_1 = arith.constant 0 : i32
    return %c0_i32, %c0_i32_0 : i32, i32
  }
  func.func @transform_3(%arg0: i32, %arg1: i32) -> (i32, i32) {
    %c0_i32 = arith.constant 0 : i32
    return %arg0, %arg1 : i32, i32
  }
  func.func @transform_4(%arg0: i32, %arg1: i32) -> (i32, i32) {
    %c0_i32 = arith.constant 0 : i32
    %c0_i32_0 = arith.constant 0 : i32
    return %arg0, %c0_i32 : i32, i32
  }
}

</mosaic_0001>

<bundles_post_ra>
// kernel: tpu_custom_call.1
= control target key start
LH: loop header
LB: loop body
LE: loop exit
PB: predicated region body
PF: predicated region fallthrough
CT: control target
= control target key end

     0   :  { %s2152_s0 = inlined_call_operand.hbm [shape: f32[256,256], index: 0, kind: input, shape index: {}]   ;;  %s2153_s1 = inlined_call_operand.hbm [shape: f32[256,256], index: 1, kind: input, shape index: {}]   ;;  %s2154_s2 = inlined_call_operand.hbm [shape: f32[256,128], index: 2, kind: input, shape index: {}]   ;;  %s2155_s3 = inlined_call_operand.hbm [shape: f32[256,256], index: 3, kind: output, shape index: {0}]   ;;  %s2156_s4 = inlined_call_operand.hbm [shape: f32[256,128], index: 4, kind: output, shape index: {1}]  }
   0x1   :  { %2178 = sst [smem:[#allocation29_spill]] %s2152_s0 }
   0x2   :  { %2179 = sst [smem:[#allocation30_spill]] %s2154_s2 }
   0x3   :  { %2180 = sst [smem:[#allocation31_spill]] %s2155_s3 }
   0x4   :  { %2181 = sst [smem:[#allocation32_spill]] %s2156_s4 }
   0x5   :  { %10 = vsyncpa [#allocation4], 0 }
   0x6   :  { %12 = vsyncpa [#allocation4 + $0x1], 0 }
   0x7   :  { %13 = vsyncpa [#allocation7], 0 }
   0x8   :  { %15 = vsyncpa [#allocation7 + $0x1], 0 }
   0x9   :  { %16 = vsyncpa [#allocation5], 0 }
   0xa   :  { %18 = vsyncpa [#allocation5 + $0x1], 0 }
   0xb   :  { %19 = vsyncpa [#allocation11], 0 }
   0xc   :  { %21 = vsyncpa [#allocation11 + $0x1], 0  ;;  %s1444_s15 = smov 0   ;;  %s1446_s16 = smov 0  }
   0xd   :  { %s1448_s17 = smov 0   ;;  %s1450_s18 = smov 0  }
   0xe   :  { %s1452_s19 = smov 0   ;;  %s1454_s20 = smov 0  }
   0xf   :  { %s1456_s21 = smov 0   ;;  %s1458_s22 = smov 0  }
  0x10   :  { %s1460_s23 = smov 0   ;;  %s1462_s24 = smov 0  }
  0x11   :  { %s1464_s25 = smov 0  }
  0x12 LB: > { %2182 = sst [smem:[#allocation17_spill]] %s1369_s15  ;;  %s1500_s26 = sadd.s32 4294967295, %s1409_s25   ;;  %s1409_s25 = sphi %s1464_s25, %s27_s25   ;;  %s1405_s24 = sphi %s1462_s24, %s2267_s24   ;;  %s1401_s23 = sphi %s1460_s23, %s2266_s23   ;;  %s1397_s22 = sphi %s1458_s22, %s2265_s22   ;;  %s1393_s21 = sphi %s1456_s21, %s2264_s21   ;;  %s1389_s20 = sphi %s1454_s20, %s2256_s20   ;;  %s1385_s19 = sphi %s1452_s19, %s2263_s19   ;;  %s1381_s18 = sphi %s1450_s18, %s2262_s18   ;;  %s1377_s17 = sphi %s1448_s17, %s2261_s17   ;;  %s1373_s16 = sphi %s1446_s16, %s2260_s16   ;;  %s1369_s15 = sphi %s1444_s15, %s2259_s15  }
  0x13   : > { %2183 = sst [smem:[#allocation18_spill]] %s1381_s18  ;;  %s913_s27 = sadd.s32 4294967294, %s1409_s25  }
  0x14   : > { %2184 = sst [smem:[#allocation19_spill]] %s1389_s20  ;;  %p61_p0 = scmp.ne.s32.totalorder %s1385_s19, %s1381_s18 }
  0x15   : > { %2185 = sst [smem:[#allocation20_spill]] %s1397_s22  ;;  %p62_p1 = scmp.eq.s32.totalorder %s1500_s26, 0 }
  0x16   : > { %p136_p2 = scmp.eq.s32.totalorder %s1500_s26, 3  ;;  %p142_p3 = scmp.eq.s32.totalorder %s913_s27, 3 }
  0x17   : > { %p1509_p4 = por %p62_p1, %p61_p0  ;;  %p161_p6 = scmp.ne.s32.totalorder %s1377_s17, %s1373_s16 }
  0x18   : > { %p1514_p5 = por %p142_p3, %p61_p0  ;;  %p167_p7 = scmp.ne.s32.totalorder %s1373_s16, %s1369_s15 }
  0x19   : > { %p914_p8 = scmp.ge.s32.totalorder %s1409_s25, 1  ;;  %p1525_p9 = por %p161_p6, %p136_p2 }
  0x1a   : > { %s2187_s30 = scalar_select %p1514_p5, 1, 0 }
  0x1b   : > { %s2189_s5 = scalar_select %p1525_p9, 1, 0 }
  0x1c   : > { %2188 = sst [smem:[#allocation21_spill]] %s2187_s30  ;;  %p175_p10 = scmp.lt.s32.totalorder %s1409_s25, 5 }
  0x1d   : > { %2190 = sst [smem:[#allocation22_spill]] %s2189_s5  ;;  %p1530_p11 = por %p167_p7, %p142_p3 }
  0x1e   : > { %p1534_p12 = pnand %p914_p8, %p175_p10  ;;  %s2194_s2 = sld [smem:[#allocation30_spill]] }
  0x1f   : > { %s2191_s6 = scalar_select %p1530_p11, 1, 0 }
  0x20   : > { %p1039_p13 = pneg %p1534_p12  ;;  %s1411_s11 = smov [#allocation8]  }
  0x21   : > { %2192 = sst [smem:[#allocation23_spill]] %s2191_s6  ;;  %s188_s12 = sshll.u32 %s1411_s11, 4  ;;  %s189_s12 = int_to_ptr.vmem [resolvable:$true] %s188_s12 }
  0x22   : > { %p1040_p0 = pnand %p1039_p13, %p62_p1  ;;  %s2157_s13 = smov 128  }
  0x23   : > { %s2159_s14 = smov 8   ;;  %s36_s27 = sadd.s32 1, %s1401_s23 }
  0x24   : > { %s186_s10 = sshll.u32 %s2194_s2, 4  ;;  %s39_s8 = sadd.s32 1, %s1405_s24  ;;  %s187_s10 = int_to_ptr.hbm [resolvable:$true] %s186_s10 }
  0x25   : > { %1042 = dma.hbm_to_vmem [thread:$0]  (!%p1040_p0), %s187_s10, 4096, %s189_s12, [#allocation7], %s2157_s13, %s2157_s13, %s2159_s14  }
  0x26   : > { %p37_p3 = scmp.ge.s32.totalorder %s36_s27, 2  ;;  %s48_s9 = sadd.s32 1, %s1389_s20 }
  0x27   : > { %p55_p6 = scmp.ne.s32.totalorder %s1389_s20, %s1385_s19  ;;  %p56_p7 = scmp.eq.s32.totalorder %s1409_s25, 0 }
  0x28   : > { %s2269_s27 = smov (%p37_p3, %s36_s27), 0  ;;  %s2271_s8 = smov (!%p37_p3, %s39_s8), %s1405_s24 }
  0x29   : > { %2195 = sst [smem:[#allocation24_spill]] %s2269_s27  ;;  %s44_s11 = ssub.s32 %s1401_s23, %s2269_s27 }
  0x2a   : > { %p1559_p8 = por %p56_p7, %p55_p6  ;;  %p41_p10 = scmp.ge.s32.totalorder %s2271_s8, 2 }
  0x2b   : > { %p1565_p13 = por %p136_p2, %p55_p6  ;;  %p1058_p0 = scmp.lt.s32.totalorder %s1409_s25, 4 }
  0x2c   : > { %s202_s12 = sand.u32 1, %s1389_s20   ;;  %s2273_s8 = smov (%p41_p10, %s2271_s8), 0 }
  0x2d   : > { %s2197_s10 = scalar_select %p1565_p13, 1, 0 }
  0x2e   : > { %2199 = sst [smem:[#allocation26_spill]] %s2273_s8  ;;  %s917_s13 = sshll.u32 %s202_s12, 7 }
  0x2f   : > { %2198 = sst [smem:[#allocation25_spill]] %s2197_s10  ;;  %s43_s14 = ssub.s32 %s1405_s24, %s2273_s8 }
  0x30   : > { %s45_s2 = sor.u32 %s44_s11, %s43_s14  ;;  %p149_p3 = scmp.eq.s32.totalorder %s43_s14, 0 }
  0x31   : > { %p46_p7 = scmp.eq.s32.totalorder %s45_s2, 0  ;;  %s975_s27 = sshll.u32 %s1405_s24, 5 }
  0x32   : > { %s2200_s6 = sadd.s32 1, %s1377_s17  ;;  %s211_s18 = sadd.s32 %s1401_s23, %s975_s27 }
  0x33   : > { %s1579_s15 = scalar_select %p149_p3, %s1377_s17, %s2200_s6  }
  0x34   : > { %s1582_s30 = scalar_select %p46_p7, %s1389_s20, %s48_s9  }
  0x35   : > { %2201 = sst [smem:[#allocation27_spill]] %s1579_s15  ;;  %s206_s4 = scalar_lea.vmem [#allocation3], %s917_s13 }
  0x36   : > { %2202 = sst [smem:[#allocation28_spill]] %s1582_s30  ;;  %s216_s5 = sshll.u32 %s206_s4, 4  ;;  %s217_s5 = int_to_ptr.vmem [resolvable:$true] %s216_s5 }
  0x37   : > { %s920_s3 = sshll.u32 %s211_s18, 3  ;;  %s2203_s0 = sld [smem:[#allocation29_spill]] }
  0x38   : > { %p1592_p2 = pnand %p1058_p0, %p1559_p8  ;;  %s203_s14 = scalar_lea.sflag [#allocation4], %s202_s12 }
  0x39   : > { %s1414_s27 = smov 256   ;;  %s2205_s4 = smov 8  }
  0x3a   : > { %s2206_s18 = smov 128   ;;  %s226_s9 = sand.u32 1, %s1409_s25  }
  0x3b   : > { %s230_s8 = scalar_lea.vmem [#allocation6], %s917_s13  ;;  %s227_s15 = scalar_lea.sflag [#allocation7], %s226_s9 }
  0x3c   : > { %s240_s22 = sshll.u32 %s230_s8, 4  ;;  %s241_s22 = int_to_ptr.vmem [resolvable:$true] %s240_s22 }
  0x3d   : > { %s213_s11 = scalar_lea.hbm %s2203_s0, %s920_s3  ;;  %s976_s3 = sshll.u32 %s1401_s23, 5 }
  0x3e   : > { %s214_s6 = sshll.u32 %s213_s11, 4  ;;  %s235_s29 = sadd.s32 %s1405_s24, %s976_s3  ;;  %s215_s6 = int_to_ptr.hbm [resolvable:$true] %s214_s6 }
  0x3f   : > { %1046 = dma.hbm_to_vmem [thread:$0]  (!%p1592_p2), %s215_s6, 2048, %s217_s5, %s203_s14, %s1414_s27, %s2206_s18, %s2205_s4  }
  0x40   : > { %s924_s10 = sshll.u32 %s235_s29, 3  ;;  %252 = sbr.rel (%p1534_p12) target bundleno = 639 (0x27f), region = 32 }
  0x41   : > { %s237_s20 = scalar_lea.hbm %s2153_s1, %s924_s10  ;;  %s1613_s5 = sand.u32 (!%p1534_p12), 1, %s1385_s19  }
  0x42   : > { %s238_s11 = sshll.u32 %s237_s20, 4  ;;  %s1616_s13 = sshll.u32 (!%p1534_p12), %s1613_s5, 7  ;;  %s239_s11 = int_to_ptr.hbm [resolvable:$true] %s238_s11 }
  0x43   : > { %1049 = dma.hbm_to_vmem [thread:$0]  (!%p1592_p2), %s239_s11, 2048, %s241_s22, %s227_s15, %s1414_s27, %s2206_s18, %s2205_s4  }
  0x44   : > { %s255_s0 = scalar_lea.sflag (!%p1534_p12), [#allocation4], %s1613_s5  ;;  %s1620_s20 = scalar_lea.vmem (!%p1534_p12), [#allocation3], %s1616_s13 }
  0x45   : > { %1348 = dma.done.wait (%p1509_p4), %s255_s0, 2048  }
  0x46   : > { %1350 = vsyncadd (%p1509_p4), %s255_s0, 4294965248  ;;  %s264_s15 = sand.u32 1, %s1500_s26   ;;  %s1628_s7 = scalar_lea.vmem [#allocation6], %s1616_s13 }
  0x47   : > { %s265_s30 = scalar_lea.sflag [#allocation7], %s264_s15 }
  0x48   : > { %1352 = dma.done.wait (%p1509_p4), %s265_s30, 2048  }
  0x49   : > { %1354 = vsyncadd (%p1509_p4), %s265_s30, 4294965248 }
  0x4a   : > { %1356 = dma.done.wait (%p62_p1), [#allocation7], 4096  }
  0x4b   : > { %1358 = vsyncadd (%p62_p1), [#allocation7], 4294963200  ;;  %s306_s8 = sand.u32 1, %s1373_s16   ;;  %s931_s12 = sshll.u32 %s1393_s21, 7  ;;  %v345_v16 = vld [vmem:[%s1628_s7] sm:$0xff]  ;;  %v346_v18 = vld [vmem:[%s1628_s7 + $0x8] sm:$0xff]  ;;  %v441_v48 = vlaneseq }
  0x4c   : > { %s1642_s2 = sshll.u32 %s306_s8, 7  ;;  %s529_s6 = scalar_lea.vmem [#allocation8], %s931_s12  ;;  %v361_v17 = vand.u32 2147483647, %v345_v16  ;;  %v362_v19 = vand.u32 2147483647, %v346_v18 }
  0x4d   : > { %v1644_v0 = vld [vmem:[%s529_s6] sm:$0xff]  ;;  %v1646_v1 = vld [vmem:[%s529_s6 + $0x8] sm:$0xff]  ;;  %v1648_v2 = vld [vmem:[%s529_s6 + $0x10] sm:$0xff]  ;;  %s2207_s26 = sld [smem:[#allocation20_spill]]  ;;  %v1695_v50 = vshrl.u32 %v441_v48, 7  ;;  %v1697_v51 = vand.u32 127, %v441_v48 }
  0x4e   : > { %v1650_v3 = vld [vmem:[%s529_s6 + $0x18] sm:$0xff]  ;;  %v1652_v4 = vld [vmem:[%s529_s6 + $0x20] sm:$0xff]  ;;  %v1654_v5 = vld [vmem:[%s529_s6 + $0x28] sm:$0xff]  ;;  %377 = vxpose.xlu0.b32.start [1/16] %v361_v17, 128  ;;  %s1719_s14 = scalar_lea.vmem [#allocation9], %s1616_s13  ;;  %s1946_s27 = scalar_lea.vmem [#allocation10], %s1642_s2 }
  0x4f   : > { %v1656_v6 = vld [vmem:[%s529_s6 + $0x30] sm:$0xff]  ;;  %v1658_v7 = vld [vmem:[%s529_s6 + $0x38] sm:$0xff]  ;;  %v1660_v8 = vld [vmem:[%s529_s6 + $0x40] sm:$0xff]  ;;  %vm461_vm0 = vcmp.eq.s32.totalorder %v1695_v50, %v1697_v51  ;;  %v443_v60 = vadd.s32 8, %v1695_v50  ;;  %p932_p4 = scmp.ne.s32.totalorder %s1393_s21, 0 }
  0x50   : > { %v1662_v9 = vld [vmem:[%s529_s6 + $0x48] sm:$0xff]  ;;  %v1664_v10 = vld [vmem:[%s529_s6 + $0x50] sm:$0xff]  ;;  %v1666_v11 = vld [vmem:[%s529_s6 + $0x58] sm:$0xff] }
  0x51   : > { %v1668_v12 = vld [vmem:[%s529_s6 + $0x60] sm:$0xff]  ;;  %v1670_v13 = vld [vmem:[%s529_s6 + $0x68] sm:$0xff]  ;;  %v1672_v14 = vld [vmem:[%s529_s6 + $0x70] sm:$0xff]  ;;  %vm462_vm3 = vcmp.eq.s32.totalorder %v443_v60, %v1697_v51 }
  0x52   : > { %v1674_v15 = vld [vmem:[%s529_s6 + $0x78] sm:$0xff]  ;;  %v347_v20 = vld [vmem:[%s1628_s7 + $0x10] sm:$0xff]  ;;  %v349_v24 = vld [vmem:[%s1628_s7 + $0x20] sm:$0xff] }
  0x53   : > { %v363_v21 = vand.u32 2147483647, %v347_v20  ;;  %v348_v22 = vld [vmem:[%s1628_s7 + $0x18] sm:$0xff]  ;;  %v365_v25 = vand.u32 2147483647, %v349_v24  ;;  %v350_v26 = vld [vmem:[%s1628_s7 + $0x28] sm:$0xff]  ;;  %p460_p1 = scmp.eq.s32.totalorder %s2207_s26, %s1393_s21 }
  0x54   : > { %v364_v23 = vand.u32 2147483647, %v348_v22  ;;  %v366_v27 = vand.u32 2147483647, %v350_v26  ;;  %v351_v28 = vld [vmem:[%s1628_s7 + $0x30] sm:$0xff]  ;;  %v352_v30 = vld [vmem:[%s1628_s7 + $0x38] sm:$0xff] }
  0x55   : > { %v367_v29 = vand.u32 2147483647, %v351_v28  ;;  %v368_v31 = vand.u32 2147483647, %v352_v30  ;;  %v353_v32 = vld [vmem:[%s1628_s7 + $0x40] sm:$0xff]  ;;  %v354_v34 = vld [vmem:[%s1628_s7 + $0x48] sm:$0xff] }
  0x56   : > { %378 = vxpose.xlu0.b32.cont [2/16] %v362_v19, 128  ;;  %v369_v33 = vand.u32 2147483647, %v353_v32  ;;  %v370_v35 = vand.u32 2147483647, %v354_v34  ;;  %v355_v36 = vld [vmem:[%s1628_s7 + $0x50] sm:$0xff]  ;;  %v356_v38 = vld [vmem:[%s1628_s7 + $0x58] sm:$0xff] }
  0x57   : > { %v371_v37 = vand.u32 2147483647, %v355_v36  ;;  %v372_v39 = vand.u32 2147483647, %v356_v38  ;;  %v357_v40 = vld [vmem:[%s1628_s7 + $0x60] sm:$0xff]  ;;  %v358_v42 = vld [vmem:[%s1628_s7 + $0x68] sm:$0xff] }
  0x58   : > { %v373_v41 = vand.u32 2147483647, %v357_v40  ;;  %v374_v43 = vand.u32 2147483647, %v358_v42  ;;  %v359_v44 = vld [vmem:[%s1628_s7 + $0x70] sm:$0xff]  ;;  %v360_v46 = vld [vmem:[%s1628_s7 + $0x78] sm:$0xff] }
  0x59   : > { %v375_v45 = vand.u32 2147483647, %v359_v44  ;;  %v376_v47 = vand.u32 2147483647, %v360_v46  ;;  %s477_s28 = scalar_select %p460_p1, 1, 0 }
  0x5a   : > { %v313_v49 = vld [vmem:[%s1620_s20] sm:$0xff]  ;;  %v314_v58 = vld [vmem:[%s1620_s20 + $0x8] sm:$0xff]  ;;  %v315_v18 = vld [vmem:[%s1620_s20 + $0x10] sm:$0xff]  ;;  %v444_v20 = vadd.s32 16, %v1695_v50  ;;  %v445_v28 = vadd.s32 24, %v1695_v50  ;;  %v446_v36 = vadd.s32 32, %v1695_v50 }
  0x5b   : > { %v478_v52 = vstv %s477_s28  ;;  %v329_v53 = vand.u32 2147483647, %v313_v49  ;;  %v330_v62 = vand.u32 2147483647, %v314_v58  ;;  %v331_v22 = vand.u32 2147483647, %v315_v18 }
  0x5c   : > { %vm1701_vm1 = vcmp.eq.s32.totalorder %v478_v52, 1  ;;  %vm463_vm5 = vcmp.eq.s32.totalorder %v444_v20, %v1697_v51  ;;  %v316_v26 = vld [vmem:[%s1620_s20 + $0x18] sm:$0xff]  ;;  %vm464_vm7 = vcmp.eq.s32.totalorder %v445_v28, %v1697_v51  ;;  %v317_v34 = vld [vmem:[%s1620_s20 + $0x20] sm:$0xff]  ;;  %vm465_vm9 = vcmp.eq.s32.totalorder %v446_v36, %v1697_v51  ;;  %v318_v42 = vld [vmem:[%s1620_s20 + $0x28] sm:$0xff] }
  0x5d   : > { %vm1707_vm2 = vmand %vm1701_vm1, %vm461_vm0  ;;  %v332_v30 = vand.u32 2147483647, %v316_v26  ;;  %v333_v38 = vand.u32 2147483647, %v317_v34  ;;  %v447_v44 = vadd.s32 40, %v1695_v50  ;;  %v319_v52 = vld [vmem:[%s1620_s20 + $0x30] sm:$0xff] }
  0x5e   : > { %379 = vxpose.xlu0.b32.cont [3/16] %v363_v21, 128  ;;  %vm1725_vm4 = vmand %vm1701_vm1, %vm462_vm3  ;;  %v334_v46 = vand.u32 2147483647, %v318_v42  ;;  %v335_v58 = vand.u32 2147483647, %v319_v52  ;;  %v449_v18 = vadd.s32 56, %v1695_v50  ;;  %v321_v26 = vld [vmem:[%s1620_s20 + $0x40] sm:$0xff] }
  0x5f   : > { %vm1740_vm6 = vmand %vm1701_vm1, %vm463_vm5  ;;  %vm466_vm11 = vcmp.eq.s32.totalorder %v447_v44, %v1697_v51  ;;  %v452_v52 = vadd.s32 80, %v1695_v50 }
  0x60   : > { %vm1755_vm8 = vmand %vm1701_vm1, %vm464_vm7  ;;  %vm468_vm15 = vcmp.eq.s32.totalorder %v449_v18, %v1697_v51 }
  0x61   : > { %vm1770_vm10 = vmand %vm1701_vm1, %vm465_vm9 }
  0x62   : > { %vm1785_vm12 = vmand %vm1701_vm1, %vm466_vm11  ;;  %vm471_vm11 = vcmp.eq.s32.totalorder %v452_v52, %v1697_v51 }
  0x63   : > { %vm1815_vm0 = vmand %vm1701_vm1, %vm468_vm15 }
  0x66   : > { %380 = vxpose.xlu0.b32.cont [4/16] %v364_v23, 128 }
  0x6e   : > { %381 = vxpose.xlu0.b32.cont [5/16] %v365_v25, 128 }
  0x76   : > { %382 = vxpose.xlu0.b32.cont [6/16] %v366_v27, 128 }
  0x7e   : > { %383 = vxpose.xlu0.b32.cont [7/16] %v367_v29, 128 }
  0x86   : > { %384 = vxpose.xlu0.b32.cont [8/16] %v368_v31, 128 }
  0x8e   : > { %385 = vxpose.xlu0.b32.cont [9/16] %v369_v33, 128  ;;  %v2216_v33 = vmov 0 }
  0x8f   : > { %v2217_v33 = vsel %vm1755_vm8, 4294967295, %v2216_v33 }
  0x96   : > { %386 = vxpose.xlu0.b32.cont [10/16] %v370_v35, 128 }
  0x9e   : > { %387 = vxpose.xlu0.b32.cont [11/16] %v371_v37, 128 }
  0xa6   : > { %388 = vxpose.xlu0.b32.cont [12/16] %v372_v39, 128 }
  0xae   : > { %389 = vxpose.xlu0.b32.cont [13/16] %v373_v41, 128 }
  0xb6   : > { %390 = vxpose.xlu0.b32.cont [14/16] %v374_v43, 128 }
  0xbe   : > { %391 = vxpose.xlu0.b32.cont [15/16] %v375_v45, 128 }
  0xc6   : > { %392 = vxpose.xlu0.b32.end [16/16] %v376_v47, 128 }
  0xf2   : > { %v393_v55 = vpop.trf.xlu0 }
  0xf3   : > { %v409_v56 = vadd.f32 %v393_v55, %v329_v53  ;;  %v448_v55 = vadd.s32 48, %v1695_v50 }
  0xf5   : > { %v1712_v59 = vmul.f32 0.5, %v409_v56  ;;  %vm467_vm13 = vcmp.eq.s32.totalorder %v448_v55, %v1697_v51 }
  0xf6   : > { %vm1800_vm14 = vmand %vm1701_vm1, %vm467_vm13 }
  0xf7   : > { %v496_v61 = vsel %vm1707_vm2, 0.0, %v1712_v59  ;;  %vm1860_vm13 = vmand %vm1701_vm1, %vm471_vm11 }
  0xf8   : > { %512 = vst [vmem:[%s1719_s14] sm:$0xff] %v496_v61 }
  0xfa   : > { %v394_v63 = vpop.trf.xlu0 }
  0xfb   : > { %v410_v16 = vadd.f32 %v394_v63, %v330_v62  ;;  %v320_v63 = vld [vmem:[%s1620_s20 + $0x38] sm:$0xff] }
  0xfd   : > { %v1730_v19 = vmul.f32 0.5, %v410_v16 }
  0xff   : > { %v497_v21 = vsel %vm1725_vm4, 0.0, %v1730_v19 }
 0x100   : > { %513 = vst [vmem:[%s1719_s14 + $0x8] sm:$0xff] %v497_v21  ;;  %v336_v21 = vand.u32 2147483647, %v320_v63  ;;  %v324_v63 = vld [vmem:[%s1620_s20 + $0x58] sm:$0xff] }
 0x102   : > { %v395_v23 = vpop.trf.xlu0 }
 0x103   : > { %v411_v24 = vadd.f32 %v395_v23, %v331_v22 }
 0x105   : > { %v1745_v27 = vmul.f32 0.5, %v411_v24  ;;  %v2224_v24 = vmov 0 }
 0x106   : > { %v2225_v24 = vsel %vm1815_vm0, 4294967295, %v2224_v24 }
 0x107   : > { %v498_v29 = vsel %vm1740_vm6, 0.0, %v1745_v27 }
 0x108   : > { %514 = vst [vmem:[%s1719_s14 + $0x10] sm:$0xff] %v498_v29  ;;  %v450_v29 = vadd.s32 64, %v1695_v50 }
 0x10a   : > { %v396_v31 = vpop.trf.xlu0  ;;  %vm469_vm3 = vcmp.eq.s32.totalorder %v450_v29, %v1697_v51 }
 0x10b   : > { %v412_v32 = vadd.f32 %v396_v31, %v332_v30  ;;  %v337_v31 = vand.u32 2147483647, %v321_v26  ;;  %vm1830_vm5 = vmand %vm1701_vm1, %vm469_vm3 }
 0x10d   : > { %v1760_v35 = vmul.f32 0.5, %v412_v32 }
 0x10f   : > { %v499_v37 = vsel %vm1755_vm8, 0.0, %v1760_v35 }
 0x110   : > { %515 = vst [vmem:[%s1719_s14 + $0x18] sm:$0xff] %v499_v37  ;;  %v322_v37 = vld [vmem:[%s1620_s20 + $0x48] sm:$0xff] }
 0x111   : > { %v338_v42 = vand.u32 2147483647, %v322_v37 }
 0x112   : > { %v397_v39 = vpop.trf.xlu0 }
 0x113   : > { %v413_v40 = vadd.f32 %v397_v39, %v333_v38  ;;  %v451_v39 = vadd.s32 72, %v1695_v50 }
 0x115   : > { %v1775_v43 = vmul.f32 0.5, %v413_v40  ;;  %vm470_vm7 = vcmp.eq.s32.totalorder %v451_v39, %v1697_v51 }
 0x116   : > { %vm1845_vm9 = vmand %vm1701_vm1, %vm470_vm7 }
 0x117   : > { %v500_v45 = vsel %vm1770_vm10, 0.0, %v1775_v43 }
 0x118   : > { %516 = vst [vmem:[%s1719_s14 + $0x20] sm:$0xff] %v500_v45 }
 0x11a   : > { %v398_v47 = vpop.trf.xlu0 }
 0x11b   : > { %v414_v48 = vadd.f32 %v398_v47, %v334_v46  ;;  %v323_v47 = vld [vmem:[%s1620_s20 + $0x50] sm:$0xff] }
 0x11d   : > { %v1790_v53 = vmul.f32 0.5, %v414_v48 }
 0x11f   : > { %v501_v56 = vsel %vm1785_vm12, 0.0, %v1790_v53 }
 0x120   : > { %517 = vst [vmem:[%s1719_s14 + $0x28] sm:$0xff] %v501_v56  ;;  %v339_v56 = vand.u32 2147483647, %v323_v47  ;;  %v455_v47 = vadd.s32 104, %v1695_v50 }
 0x122   : > { %v399_v60 = vpop.trf.xlu0 }
 0x123   : > { %v415_v61 = vadd.f32 %v399_v60, %v335_v58 }
 0x125   : > { %v1805_v16 = vmul.f32 0.5, %v415_v61 }
 0x127   : > { %v502_v20 = vsel %vm1800_vm14, 0.0, %v1805_v16 }
 0x128   : > { %518 = vst [vmem:[%s1719_s14 + $0x30] sm:$0xff] %v502_v20  ;;  %v453_v20 = vadd.s32 88, %v1695_v50 }
 0x12a   : > { %v400_v22 = vpop.trf.xlu0  ;;  %vm472_vm15 = vcmp.eq.s32.totalorder %v453_v20, %v1697_v51 }
 0x12b   : > { %v416_v23 = vadd.f32 %v400_v22, %v336_v21  ;;  %v340_v22 = vand.u32 2147483647, %v324_v63  ;;  %vm1875_vm3 = vmand %vm1701_vm1, %vm472_vm15  ;;  %vm474_vm15 = vcmp.eq.s32.totalorder %v455_v47, %v1697_v51  ;;  %v327_v63 = vld [vmem:[%s1620_s20 + $0x70] sm:$0xff] }
 0x12d   : > { %v1820_v28 = vmul.f32 0.5, %v416_v23 }
 0x12f   : > { %v503_v30 = vsel %vm1815_vm0, 0.0, %v1820_v28 }
 0x130   : > { %519 = vst [vmem:[%s1719_s14 + $0x38] sm:$0xff] %v503_v30  ;;  %v325_v30 = vld [vmem:[%s1620_s20 + $0x60] sm:$0xff] }
 0x131   : > { %v341_v37 = vand.u32 2147483647, %v325_v30 }
 0x132   : > { %v401_v32 = vpop.trf.xlu0 }
 0x133   : > { %v417_v34 = vadd.f32 %v401_v32, %v337_v31  ;;  %v454_v32 = vadd.s32 96, %v1695_v50 }
 0x135   : > { %v1835_v38 = vmul.f32 0.5, %v417_v34  ;;  %vm473_vm7 = vcmp.eq.s32.totalorder %v454_v32, %v1697_v51 }
 0x136   : > { %vm1890_vm11 = vmand %vm1701_vm1, %vm473_vm7 }
 0x137   : > { %v504_v40 = vsel %vm1830_vm5, 0.0, %v1835_v38  ;;  %vm1905_vm7 = vmand %vm1701_vm1, %vm474_vm15 }
 0x138   : > { %520 = vst [vmem:[%s1719_s14 + $0x40] sm:$0xff] %v504_v40 }
 0x13a   : > { %v402_v44 = vpop.trf.xlu0 }
 0x13b   : > { %v418_v45 = vadd.f32 %v402_v44, %v338_v42  ;;  %v326_v44 = vld [vmem:[%s1620_s20 + $0x68] sm:$0xff] }
 0x13d   : > { %v1850_v48 = vmul.f32 0.5, %v418_v45 }
 0x13f   : > { %v505_v55 = vsel %vm1845_vm9, 0.0, %v1850_v48 }
 0x140   : > { %521 = vst [vmem:[%s1719_s14 + $0x48] sm:$0xff] %v505_v55  ;;  %v342_v55 = vand.u32 2147483647, %v326_v44 }
 0x142   : > { %v403_v58 = vpop.trf.xlu0 }
 0x143   : > { %v419_v60 = vadd.f32 %v403_v58, %v339_v56 }
 0x145   : > { %v1865_v18 = vmul.f32 0.5, %v419_v60 }
 0x147   : > { %v506_v21 = vsel %vm1860_vm13, 0.0, %v1865_v18 }
 0x148   : > { %522 = vst [vmem:[%s1719_s14 + $0x50] sm:$0xff] %v506_v21  ;;  %v456_v21 = vadd.s32 112, %v1695_v50 }
 0x14a   : > { %v404_v23 = vpop.trf.xlu0  ;;  %vm475_vm0 = vcmp.eq.s32.totalorder %v456_v21, %v1697_v51 }
 0x14b   : > { %v420_v26 = vadd.f32 %v404_v23, %v340_v22  ;;  %v343_v23 = vand.u32 2147483647, %v327_v63  ;;  %vm1920_vm15 = vmand %vm1701_vm1, %vm475_vm0 }
 0x14d   : > { %v1880_v31 = vmul.f32 0.5, %v420_v26 }
 0x14f   : > { %v507_v34 = vsel %vm1875_vm3, 0.0, %v1880_v31 }
 0x150   : > { %523 = vst [vmem:[%s1719_s14 + $0x58] sm:$0xff] %v507_v34  ;;  %v328_v34 = vld [vmem:[%s1620_s20 + $0x78] sm:$0xff] }
 0x151   : > { %v344_v44 = vand.u32 2147483647, %v328_v34 }
 0x152   : > { %v405_v39 = vpop.trf.xlu0 }
 0x153   : > { %v421_v40 = vadd.f32 %v405_v39, %v341_v37  ;;  %v457_v39 = vadd.s32 120, %v1695_v50 }
 0x155   : > { %v1895_v45 = vmul.f32 0.5, %v421_v40  ;;  %vm476_vm8 = vcmp.eq.s32.totalorder %v457_v39, %v1697_v51 }
 0x156   : > { %vm1935_vm0 = vmand %vm1701_vm1, %vm476_vm8 }
 0x157   : > { %v508_v52 = vsel %vm1890_vm11, 0.0, %v1895_v45 }
 0x158   : > { %524 = vst [vmem:[%s1719_s14 + $0x60] sm:$0xff] %v508_v52 }
 0x15a   : > { %v406_v56 = vpop.trf.xlu0 }
 0x15b   : > { %v422_v58 = vadd.f32 %v406_v56, %v342_v55  ;;  %v2240_v55 = vmov 0 }
 0x15c   : > { %v2241_v55 = vsel %vm1935_vm0, 4294967295, %v2240_v55 }
 0x15d   : > { %v1910_v20 = vmul.f32 0.5, %v422_v58 }
 0x15f   : > { %v509_v22 = vsel %vm1905_vm7, 0.0, %v1910_v20 }
 0x160   : > { %525 = vst [vmem:[%s1719_s14 + $0x68] sm:$0xff] %v509_v22 }
 0x162   : > { %v407_v26 = vpop.trf.xlu0 }
 0x163   : > { %v423_v30 = vadd.f32 %v407_v26, %v343_v23 }
 0x165   : > { %v1925_v37 = vmul.f32 0.5, %v423_v30 }
 0x167   : > { %v510_v40 = vsel %vm1920_vm15, 0.0, %v1925_v37 }
 0x168   : > { %526 = vst [vmem:[%s1719_s14 + $0x70] sm:$0xff] %v510_v40 }
 0x16a   : > { %v408_v47 = vpop.trf.xlu0 }
 0x16b   : > { %v424_v52 = vadd.f32 %v408_v47, %v344_v44 }
 0x16c   : > { %549 = sbr.rel (%p932_p4) target bundleno = 386 (0x182), region = 48 }
 0x16d   : > { %v1939_v56 = vmul.f32 0.5, %v424_v52 }
 0x16f   : > { %v511_v50 = vsel %vm1935_vm0, 0.0, %v1939_v56 }
 0x170   : > { %527 = vst [vmem:[%s1719_s14 + $0x78] sm:$0xff] %v511_v50 }
 0x171   : > { %v1415_v51 = vmov 0.0  }
 0x172   : > { %550 = vst [vmem:[#allocation2 + $0x30] sm:$0xff] %v1415_v51 }
 0x173   : > { %551 = vst [vmem:[#allocation2] sm:$0xff] %v1415_v51 }
 0x174   : > { %552 = vst [vmem:[#allocation2 + $0x58] sm:$0xff] %v1415_v51 }
 0x175   : > { %553 = vst [vmem:[#allocation2 + $0x18] sm:$0xff] %v1415_v51 }
 0x176   : > { %554 = vst [vmem:[#allocation2 + $0x50] sm:$0xff] %v1415_v51 }
 0x177   : > { %555 = vst [vmem:[#allocation2 + $0x68] sm:$0xff] %v1415_v51 }
 0x178   : > { %556 = vst [vmem:[#allocation2 + $0x8] sm:$0xff] %v1415_v51 }
 0x179   : > { %557 = vst [vmem:[#allocation2 + $0x48] sm:$0xff] %v1415_v51 }
 0x17a   : > { %558 = vst [vmem:[#allocation2 + $0x40] sm:$0xff] %v1415_v51 }
 0x17b   : > { %559 = vst [vmem:[#allocation2 + $0x20] sm:$0xff] %v1415_v51 }
 0x17c   : > { %560 = vst [vmem:[#allocation2 + $0x10] sm:$0xff] %v1415_v51 }
 0x17d   : > { %561 = vst [vmem:[#allocation2 + $0x38] sm:$0xff] %v1415_v51 }
 0x17e   : > { %562 = vst [vmem:[#allocation2 + $0x60] sm:$0xff] %v1415_v51 }
 0x17f   : > { %563 = vst [vmem:[#allocation2 + $0x70] sm:$0xff] %v1415_v51 }
 0x180   : > { %564 = vst [vmem:[#allocation2 + $0x78] sm:$0xff] %v1415_v51 }
 0x181   : > { %565 = vst [vmem:[#allocation2 + $0x28] sm:$0xff] %v1415_v51 }
 0x182 PF: > { %980 = vmatpush.msra.mxu2 %v1674_v15  ;;  %981 = vmatpush.msra.mxu3 %v1674_v15  ;;  %vm949_vm1 = vmneg %vm1830_vm5  ;;  %v572_v41 = vld [vmem:[#allocation2 + $0x8] sm:$0xff]  ;;  %p965_p12 = scmp.ne.s32.totalorder %s1393_s21, 1 }
 0x183   : > { %582 = vmatpush.msra.mxu0 %v1674_v15  ;;  %979 = vmatpush.msra.mxu1 %v1674_v15  ;;  %vm957_vm8 = vmneg %vm1890_vm11  ;;  %v573_v61 = vld [vmem:[#allocation2 + $0x48] sm:$0xff] }
 0x184   : > { %983 = vmatpush.msra.mxu2 %v1672_v14  ;;  %984 = vmatpush.msra.mxu3 %v1672_v14  ;;  %vm933_vm0 = vmneg %vm1707_vm2 }
 0x185   : > { %583 = vmatpush.msra.mxu0 %v1672_v14  ;;  %982 = vmatpush.msra.mxu1 %v1672_v14  ;;  %vm941_vm5 = vmneg %vm1770_vm10 }
 0x186   : > { %986 = vmatpush.msra.mxu2 %v1670_v13  ;;  %987 = vmatpush.msra.mxu3 %v1670_v13  ;;  %vm951_vm2 = vmneg %vm1845_vm9  ;;  %v579_v17 = vld [vmem:[#allocation2 + $0x70] sm:$0xff] }
 0x187   : > { %584 = vmatpush.msra.mxu0 %v1670_v13  ;;  %985 = vmatpush.msra.mxu1 %v1670_v13  ;;  %vm959_vm11 = vmneg %vm1905_vm7  ;;  %v571_v13 = vld [vmem:[#allocation2 + $0x68] sm:$0xff] }
 0x188   : > { %989 = vmatpush.msra.mxu2 %v1668_v12  ;;  %990 = vmatpush.msra.mxu3 %v1668_v12  ;;  %vm935_vm10 = vmneg %vm1725_vm4  ;;  %v581_v58 = vld [vmem:[#allocation2 + $0x28] sm:$0xff] }
 0x189   : > { %585 = vmatpush.msra.mxu0 %v1668_v12  ;;  %988 = vmatpush.msra.mxu1 %v1668_v12  ;;  %vm953_vm9 = vmneg %vm1860_vm13  ;;  %v567_v12 = vld [vmem:[#allocation2] sm:$0xff] }
 0x18a   : > { %992 = vmatpush.msra.mxu2 %v1666_v11  ;;  %993 = vmatpush.msra.mxu3 %v1666_v11  ;;  %vm961_vm7 = vmneg %vm1920_vm15 }
 0x18b   : > { %586 = vmatpush.msra.mxu0 %v1666_v11  ;;  %991 = vmatpush.msra.mxu1 %v1666_v11  ;;  %vm937_vm4 = vmneg %vm1740_vm6 }
 0x18c   : > { %995 = vmatpush.msra.mxu2 %v1664_v10  ;;  %996 = vmatpush.msra.mxu3 %v1664_v10  ;;  %vm955_vm13 = vmneg %vm1875_vm3 }
 0x18d   : > { %587 = vmatpush.msra.mxu0 %v1664_v10  ;;  %994 = vmatpush.msra.mxu1 %v1664_v10 }
 0x18e   : > { %998 = vmatpush.msra.mxu2 %v1662_v9  ;;  %999 = vmatpush.msra.mxu3 %v1662_v9 }
 0x18f   : > { %588 = vmatpush.msra.mxu0 %v1662_v9  ;;  %997 = vmatpush.msra.mxu1 %v1662_v9 }
 0x190   : > { %1001 = vmatpush.msra.mxu2 %v1660_v8  ;;  %1002 = vmatpush.msra.mxu3 %v1660_v8 }
 0x191   : > { %589 = vmatpush.msra.mxu0 %v1660_v8  ;;  %1000 = vmatpush.msra.mxu1 %v1660_v8 }
 0x192   : > { %1004 = vmatpush.msra.mxu2 %v1658_v7  ;;  %1005 = vmatpush.msra.mxu3 %v1658_v7 }
 0x193   : > { %590 = vmatpush.msra.mxu0 %v1658_v7  ;;  %1003 = vmatpush.msra.mxu1 %v1658_v7  ;;  %v578_v7 = vld [vmem:[#allocation2 + $0x60] sm:$0xff] }
 0x194   : > { %1007 = vmatpush.msra.mxu2 %v1656_v6  ;;  %1008 = vmatpush.msra.mxu3 %v1656_v6 }
 0x195   : > { %591 = vmatpush.msra.mxu0 %v1656_v6  ;;  %1006 = vmatpush.msra.mxu1 %v1656_v6  ;;  %v574_v6 = vld [vmem:[#allocation2 + $0x40] sm:$0xff] }
 0x196   : > { %1010 = vmatpush.msra.mxu2 %v1654_v5  ;;  %1011 = vmatpush.msra.mxu3 %v1654_v5 }
 0x197   : > { %592 = vmatpush.msra.mxu0 %v1654_v5  ;;  %1009 = vmatpush.msra.mxu1 %v1654_v5 }
 0x198   : > { %1013 = vmatpush.msra.mxu2 %v1652_v4  ;;  %1014 = vmatpush.msra.mxu3 %v1652_v4 }
 0x199   : > { %593 = vmatpush.msra.mxu0 %v1652_v4  ;;  %1012 = vmatpush.msra.mxu1 %v1652_v4 }
 0x19a   : > { %1016 = vmatpush.msra.mxu2 %v1650_v3  ;;  %1017 = vmatpush.msra.mxu3 %v1650_v3 }
 0x19b   : > { %594 = vmatpush.msra.mxu0 %v1650_v3  ;;  %1015 = vmatpush.msra.mxu1 %v1650_v3 }
 0x19c   : > { %1019 = vmatpush.msra.mxu2 %v1648_v2  ;;  %1020 = vmatpush.msra.mxu3 %v1648_v2 }
 0x19d   : > { %595 = vmatpush.msra.mxu0 %v1648_v2  ;;  %1018 = vmatpush.msra.mxu1 %v1648_v2 }
 0x19e   : > { %1022 = vmatpush.msra.mxu2 %v1646_v1  ;;  %1023 = vmatpush.msra.mxu3 %v1646_v1 }
 0x19f   : > { %596 = vmatpush.msra.mxu0 %v1646_v1  ;;  %1021 = vmatpush.msra.mxu1 %v1646_v1  ;;  %v570_v1 = vld [vmem:[#allocation2 + $0x50] sm:$0xff] }
 0x1a0   : > { %1025 = vmatpush.msra.mxu2 %v1644_v0  ;;  %1026 = vmatpush.msra.mxu3 %v1644_v0 }
 0x1a1   : > { %950 = vmatmul.msk.f32.vlgmr.msra.gmra.mxu2 %vm949_vm1, %v1835_v38  ;;  %958 = vmatmul.msk.f32.vlgmr.msra.gmra.mxu3 %vm957_vm8, %v1895_v45  ;;  %vm943_vm1 = vmneg %vm1785_vm12  ;;  %vm2243_vm8 = vnez %v2217_v33  ;;  %v577_v45 = vld [vmem:[#allocation2 + $0x38] sm:$0xff] }
 0x1a2   : > { %597 = vmatpush.msra.mxu0 %v1644_v0  ;;  %1024 = vmatpush.msra.mxu1 %v1644_v0  ;;  %vm945_vm12 = vmneg %vm1800_vm14  ;;  %v566_v0 = vld [vmem:[#allocation2 + $0x30] sm:$0xff] }
 0x1a3   : > { %934 = vmatmul.msk.f32.vlgmr.msra.gmra.mxu0 %vm933_vm0, %v1712_v59  ;;  %942 = vmatmul.msk.f32.vlgmr.msra.gmra.mxu1 %vm941_vm5, %v1775_v43  ;;  %vm2242_vm0 = vnez %v2241_v55  ;;  %vm939_vm6 = vmneg %vm2243_vm8  ;;  %vm2244_vm5 = vnez %v2225_v24  ;;  %v575_v59 = vld [vmem:[#allocation2 + $0x20] sm:$0xff]  ;;  %v580_v24 = vld [vmem:[#allocation2 + $0x78] sm:$0xff] }
 0x1a4   : > { %vm963_vm15 = vmneg %vm2242_vm0 }
 0x1a5   : > { %vm947_vm14 = vmneg %vm2244_vm5 }
 0x1a9   : > { %952 = vmatmul.msk.f32.gmra.mxu2 %vm951_vm2, %v1850_v48  ;;  %960 = vmatmul.msk.f32.gmra.mxu3 %vm959_vm11, %v1910_v20  ;;  %v569_v48 = vld [vmem:[#allocation2 + $0x18] sm:$0xff] }
 0x1ab   : > { %936 = vmatmul.msk.f32.gmra.mxu0 %vm935_vm10, %v1730_v19  ;;  %944 = vmatmul.msk.f32.gmra.mxu1 %vm943_vm1, %v1790_v53 }
 0x1b1   : > { %954 = vmatmul.msk.f32.gmra.mxu2 %vm953_vm9, %v1865_v18  ;;  %962 = vmatmul.msk.f32.gmra.mxu3 %vm961_vm7, %v1925_v37 }
 0x1b3   : > { %938 = vmatmul.msk.f32.gmra.mxu0 %vm937_vm4, %v1745_v27  ;;  %946 = vmatmul.msk.f32.gmra.mxu1 %vm945_vm12, %v1805_v16  ;;  %v576_v16 = vld [vmem:[#allocation2 + $0x10] sm:$0xff] }
 0x1b9   : > { %956 = vmatmul.msk.f32.gmra.mxu2 %vm955_vm13, %v1880_v31  ;;  %964 = vmatmul.msk.f32.gmra.mxu3 %vm963_vm15, %v1939_v56 }
 0x1bb   : > { %940 = vmatmul.msk.f32.gmra.mxu0 %vm939_vm6, %v1760_v35  ;;  %948 = vmatmul.msk.f32.gmra.mxu1 %vm947_vm14, %v1820_v28  ;;  %v568_v35 = vld [vmem:[#allocation2 + $0x58] sm:$0xff] }
 0x220   : > { %v599_v2 = vpop.f32.mrf.mxu0  ;;  %v611_v3 = vpop.f32.mrf.mxu1 }
 0x221   : > { %v647_v4 = vadd.f32 %v599_v2, %v566_v0  ;;  %v651_v5 = vadd.f32 %v611_v3, %v570_v1 }
 0x223   : > { %663 = vst [vmem:[#allocation2 + $0x30] sm:$0xff] %v647_v4 }
 0x224   : > { %667 = vst [vmem:[#allocation2 + $0x50] sm:$0xff] %v651_v5  ;;  %v623_v8 = vpop.f32.mrf.mxu2  ;;  %v635_v9 = vpop.f32.mrf.mxu3 }
 0x225   : > { %v655_v10 = vadd.f32 %v623_v8, %v574_v6  ;;  %v659_v11 = vadd.f32 %v635_v9, %v578_v7 }
 0x227   : > { %671 = vst [vmem:[#allocation2 + $0x40] sm:$0xff] %v655_v10 }
 0x228   : > { %675 = vst [vmem:[#allocation2 + $0x60] sm:$0xff] %v659_v11  ;;  %v602_v14 = vpop.f32.mrf.mxu0  ;;  %v614_v15 = vpop.f32.mrf.mxu1 }
 0x229   : > { %v648_v54 = vadd.f32 %v602_v14, %v567_v12  ;;  %v652_v57 = vadd.f32 %v614_v15, %v571_v13 }
 0x22b   : > { %664 = vst [vmem:[#allocation2] sm:$0xff] %v648_v54 }
 0x22c   : > { %668 = vst [vmem:[#allocation2 + $0x68] sm:$0xff] %v652_v57  ;;  %v626_v19 = vpop.f32.mrf.mxu2  ;;  %v638_v25 = vpop.f32.mrf.mxu3 }
 0x22d   : > { %v656_v27 = vadd.f32 %v626_v19, %v575_v59  ;;  %v660_v33 = vadd.f32 %v638_v25, %v579_v17 }
 0x22f   : > { %672 = vst [vmem:[#allocation2 + $0x20] sm:$0xff] %v656_v27 }
 0x230   : > { %676 = vst [vmem:[#allocation2 + $0x70] sm:$0xff] %v660_v33  ;;  %v605_v43 = vpop.f32.mrf.mxu0  ;;  %v617_v49 = vpop.f32.mrf.mxu1 }
 0x231   : > { %v649_v53 = vadd.f32 %v605_v43, %v568_v35  ;;  %v653_v62 = vadd.f32 %v617_v49, %v572_v41 }
 0x233   : > { %665 = vst [vmem:[#allocation2 + $0x58] sm:$0xff] %v649_v53 }
 0x234   : > { %669 = vst [vmem:[#allocation2 + $0x8] sm:$0xff] %v653_v62  ;;  %v629_v28 = vpop.f32.mrf.mxu2  ;;  %v641_v36 = vpop.f32.mrf.mxu3 }
 0x235   : > { %v657_v38 = vadd.f32 %v629_v28, %v576_v16  ;;  %v661_v46 = vadd.f32 %v641_v36, %v580_v24 }
 0x237   : > { %673 = vst [vmem:[#allocation2 + $0x10] sm:$0xff] %v657_v38 }
 0x238   : > { %677 = vst [vmem:[#allocation2 + $0x78] sm:$0xff] %v661_v46  ;;  %v608_v18 = vpop.f32.mrf.mxu0  ;;  %v620_v29 = vpop.f32.mrf.mxu1 }
 0x239   : > { %v650_v31 = vadd.f32 %v608_v18, %v569_v48  ;;  %v654_v42 = vadd.f32 %v620_v29, %v573_v61 }
 0x23b   : > { %666 = vst [vmem:[#allocation2 + $0x18] sm:$0xff] %v650_v31 }
 0x23c   : > { %670 = vst [vmem:[#allocation2 + $0x48] sm:$0xff] %v654_v42  ;;  %v632_v60 = vpop.f32.mrf.mxu2  ;;  %v644_v63 = vpop.f32.mrf.mxu3  ;;  %682 = sbr.rel (%p965_p12) target bundleno = 594 (0x252), region = 52 }
 0x23d   : > { %v658_v20 = vadd.f32 %v632_v60, %v577_v45  ;;  %v662_v21 = vadd.f32 %v644_v63, %v581_v58 }
 0x23f   : > { %674 = vst [vmem:[#allocation2 + $0x38] sm:$0xff] %v658_v20 }
 0x240   : > { %678 = vst [vmem:[#allocation2 + $0x28] sm:$0xff] %v662_v21 }
 0x241   : > { %v683_v22 = vld [vmem:[#allocation2 + $0x30] sm:$0xff]  ;;  %v684_v23 = vld [vmem:[#allocation2] sm:$0xff]  ;;  %v685_v26 = vld [vmem:[#allocation2 + $0x58] sm:$0xff] }
 0x242   : > { %699 = vst [vmem:[%s1946_s27] sm:$0xff] %v683_v22  ;;  %v686_v30 = vld [vmem:[#allocation2 + $0x18] sm:$0xff]  ;;  %v687_v32 = vld [vmem:[#allocation2 + $0x50] sm:$0xff]  ;;  %v688_v34 = vld [vmem:[#allocation2 + $0x68] sm:$0xff] }
 0x243   : > { %700 = vst [vmem:[%s1946_s27 + $0x8] sm:$0xff] %v684_v23  ;;  %v689_v37 = vld [vmem:[#allocation2 + $0x8] sm:$0xff]  ;;  %v691_v40 = vld [vmem:[#allocation2 + $0x40] sm:$0xff]  ;;  %v693_v47 = vld [vmem:[#allocation2 + $0x10] sm:$0xff] }
 0x244   : > { %701 = vst [vmem:[%s1946_s27 + $0x10] sm:$0xff] %v685_v26  ;;  %v690_v39 = vld [vmem:[#allocation2 + $0x48] sm:$0xff]  ;;  %v692_v44 = vld [vmem:[#allocation2 + $0x20] sm:$0xff]  ;;  %v696_v56 = vld [vmem:[#allocation2 + $0x70] sm:$0xff] }
 0x245   : > { %702 = vst [vmem:[%s1946_s27 + $0x18] sm:$0xff] %v686_v30  ;;  %v695_v55 = vld [vmem:[#allocation2 + $0x60] sm:$0xff]  ;;  %v697_v50 = vld [vmem:[#allocation2 + $0x78] sm:$0xff] }
 0x246   : > { %703 = vst [vmem:[%s1946_s27 + $0x20] sm:$0xff] %v687_v32  ;;  %v694_v52 = vld [vmem:[#allocation2 + $0x38] sm:$0xff] }
 0x247   : > { %704 = vst [vmem:[%s1946_s27 + $0x28] sm:$0xff] %v688_v34  ;;  %v698_v51 = vld [vmem:[#allocation2 + $0x28] sm:$0xff] }
 0x248   : > { %705 = vst [vmem:[%s1946_s27 + $0x30] sm:$0xff] %v689_v37 }
 0x249   : > { %706 = vst [vmem:[%s1946_s27 + $0x38] sm:$0xff] %v690_v39 }
 0x24a   : > { %707 = vst [vmem:[%s1946_s27 + $0x40] sm:$0xff] %v691_v40 }
 0x24b   : > { %708 = vst [vmem:[%s1946_s27 + $0x48] sm:$0xff] %v692_v44 }
 0x24c   : > { %709 = vst [vmem:[%s1946_s27 + $0x50] sm:$0xff] %v693_v47 }
 0x24d   : > { %710 = vst [vmem:[%s1946_s27 + $0x58] sm:$0xff] %v694_v52 }
 0x24e   : > { %711 = vst [vmem:[%s1946_s27 + $0x60] sm:$0xff] %v695_v55 }
 0x24f   : > { %712 = vst [vmem:[%s1946_s27 + $0x68] sm:$0xff] %v696_v56 }
 0x250   : > { %713 = vst [vmem:[%s1946_s27 + $0x70] sm:$0xff] %v697_v50 }
 0x251   : > { %714 = vst [vmem:[%s1946_s27 + $0x78] sm:$0xff] %v698_v51 }
 0x252 PF: > { %s2245_s4 = sld [smem:[#allocation20_spill]]  ;;  %s735_s3 = sshll.u32 %s1719_s14, 4  ;;  %s736_s3 = int_to_ptr.vmem [resolvable:$true] %s735_s3 }
 0x253   : > { %s2247_s13 = sld [smem:[#allocation31_spill]]  ;;  %s716_s15 = scalar_lea.sflag [#allocation5], %s1613_s5 }
 0x258   : > { %s977_s9 = sshll.u32 %s2245_s4, 5 }
 0x259   : > { %s732_s22 = sadd.s32 %s1393_s21, %s977_s9  ;;  %s1267_s21 = scalar_lea.hbm %s2247_s13, 512 }
 0x25a   : > { %s970_s29 = sshll.u32 %s732_s22, 3 }
 0x25b   : > { %s734_s0 = scalar_lea.hbm %s2247_s13, %s970_s29 }
 0x25c   : > { %s737_s20 = sshll.u32 %s734_s0, 4  ;;  %s738_s20 = int_to_ptr.hbm [resolvable:$true] %s737_s20 }
 0x25d   : > { %s1261_s30 = sshra.s32 %s738_s20, 4  ;;  %s1262_s30 = int_to_ptr.hbm [resolvable:$true] %s1261_s30 }
 0x25e   : > { %s1263_s7 = scalar_lea.hbm %s1262_s30, 128  ;;  %p1268_p0 = scmp.lt.s32.totalorder %s1262_s30, %s2247_s13 }
 0x25f   : > { %p1264_p6 = scmp.ne.s32.totalorder %s1262_s30, %s1263_s7  ;;  %p1269_p3 = scmp.lt.s32.totalorder %s1267_s21, %s1263_s7 }
 0x261   : > { %p1265_p8 = pnand %p1264_p6, %p1565_p13  ;;  %p1270_p7 = por %p1269_p3, %p1268_p0 }
 0x263   : > { %p1266_p10 = pneg %p1265_p8 }
 0x265   : > { %p1271_p2 = pnand %p1270_p7, %p1266_p10 }
 0x267   : > { %1274 = shalt.err (!%p1271_p2)
}
 0x268   : > { %s1416_s5 = smov 128   ;;  %s1417_s14 = smov 256  }
 0x269   : > { %s1418_s9 = smov 8   ;;  %s978_s22 = sshll.u32 %s2245_s4, 7 }
 0x26a   : > { %1035 = dma.vmem_to_hbm [thread:$0]  (%p1565_p13), %s736_s3, 2048, %s738_s20, %s716_s15, %s1416_s5, %s1417_s14, %s1418_s9  }
 0x26b   : > { %s2249_s11 = sld [smem:[#allocation32_spill]]  ;;  %s752_s30 = sshll.u32 %s1946_s27, 4  ;;  %s753_s30 = int_to_ptr.vmem [resolvable:$true] %s752_s30 }
 0x26c   : > { %s721_s12 = scalar_lea.sflag [#allocation11], %s306_s8 }
 0x271   : > { %s751_s0 = scalar_lea.hbm %s2249_s11, %s978_s22  ;;  %s1295_s4 = scalar_lea.hbm %s2249_s11, 256 }
 0x272   : > { %s754_s7 = sshll.u32 %s751_s0, 4  ;;  %s755_s7 = int_to_ptr.hbm [resolvable:$true] %s754_s7 }
 0x273   : > { %s1289_s2 = sshra.s32 %s755_s7, 4  ;;  %s1290_s2 = int_to_ptr.hbm [resolvable:$true] %s1289_s2 }
 0x274   : > { %s1291_s21 = scalar_lea.hbm %s1290_s2, 128  ;;  %p1296_p13 = scmp.lt.s32.totalorder %s1290_s2, %s2249_s11 }
 0x275   : > { %p1292_p1 = scmp.ne.s32.totalorder %s1290_s2, %s1291_s21  ;;  %p1297_p6 = scmp.lt.s32.totalorder %s1295_s4, %s1291_s21 }
 0x277   : > { %p1293_p4 = pnand %p1292_p1, %p1525_p9  ;;  %p1298_p8 = por %p1297_p6, %p1296_p13 }
 0x279   : > { %p1294_p12 = pneg %p1293_p4 }
 0x27b   : > { %p1299_p10 = pnand %p1298_p8, %p1294_p12 }
 0x27d   : > { %1302 = shalt.err (!%p1299_p10)
}
 0x27e   : > { %1036 = dma.vmem_to_hbm [thread:$0]  (%p1525_p9), %s753_s30, 2048, %s755_s7, %s721_s12, %s1416_s5, %s1416_s5, %s1418_s9  }
 0x27f PF: > { %s2250_s8 = sld [smem:[#allocation18_spill]]  ;;  %p1060_p0 = scmp.ge.s32.totalorder %s1409_s25, 2 }
 0x281   : > { %p1051_p3 = pnand %p1060_p0, %p1514_p5 }
 0x283   : > { %p1052_p7 = pneg %p1051_p3 }
 0x285   : > { %s769_s6 = sand.u32 1, %s2250_s8  }
 0x286   : > { %s770_s26 = scalar_lea.sflag [#allocation5], %s769_s6 }
 0x287   : > { %1360 = dma.done.wait (%p1052_p7), %s770_s26, 2048  }
 0x288   : > { %1362 = vsyncadd (%p1052_p7), %s770_s26, 4294965248  ;;  %s2252_s14 = sld [smem:[#allocation17_spill]]  ;;  %p1054_p2 = pnand %p1060_p0, %p1530_p11 }
 0x28a   : > { %p1055_p1 = pneg %p1054_p2 }
 0x28e   : > { %s779_s29 = sand.u32 1, %s2252_s14  }
 0x28f   : > { %s780_s28 = scalar_lea.sflag [#allocation11], %s779_s29 }
 0x290   : > { %1364 = dma.done.wait (%p1055_p1), %s780_s28, 2048  }
 0x291   : > { %1366 = vsyncadd (%p1055_p1), %s780_s28, 4294965248  ;;  %s27_s25 = sadd.s32 1, %s1409_s25   ;;  %s2254_s5 = sld [smem:[#allocation27_spill]] }
 0x292   : > { %p24_p9 = scmp.ge.s32.totalorder %s27_s25, 6   ;;  %s2255_s9 = sld [smem:[#allocation19_spill]] }
 0x293   : > { %s2256_s20 = sld [smem:[#allocation28_spill]]  ;;  %s2259_s15 = smov %s1373_s16 }
 0x294   : > { %s2257_s10 = sld [smem:[#allocation24_spill]]  ;;  %s2260_s16 = smov %s1377_s17 }
 0x295   : > { %s2258_s0 = sld [smem:[#allocation26_spill]]  ;;  %s2262_s18 = smov %s1385_s19 }
 0x296   : > { %s2264_s21 = smov %s1401_s23  ;;  %s2265_s22 = smov %s1405_s24 }
 0x297   : > { %s2261_s17 = smov %s2254_s5  ;;  %26 = sbr.rel (!%p24_p9) target bundleno = 18 (0x12), region = 120 }
 0x298   : > { %s2263_s19 = smov %s2255_s9 }
 0x29a   : > { %s2266_s23 = smov %s2257_s10 }
 0x29b   : > { %s2267_s24 = smov %s2258_s0 }
 0x29c   :  { %786 = vsyncpa [#allocation4], 1 }
 0x29d   :  { %788 = vsyncpa [#allocation4 + $0x1], 1 }
 0x29e   :  { %789 = vsyncpa [#allocation7], 1 }
 0x29f   :  { %791 = vsyncpa [#allocation7 + $0x1], 1 }
 0x2a0   :  { %792 = vsyncpa [#allocation5], 1 }
 0x2a1   :  { %794 = vsyncpa [#allocation5 + $0x1], 1 }
 0x2a2   :  { %795 = vsyncpa [#allocation11], 1 }
 0x2a3   :  { %797 = vsyncpa [#allocation11 + $0x1], 1 }

</bundles_post_ra>
